<compile_context>
chip_gen: v7x
topology: tpu7x:2x2x1
jax: 0.10.0
libtpu: 0.0.40
codegen_flags: <defaults>
</compile_context>

<pallas_src>
import functools

import jax
import jax.numpy as jnp
from jax import lax
from jax.experimental import pallas as pl
from jax.experimental.pallas import tpu as pltpu


def _tile_sums(pred, tgt, tr):
    """Per-row picked log-prob and per-row Frobenius norm for one batch tile.

    pred: (TB, C) f32 log-probs, tgt: (TB, 1) i32, tr: (TB, K, K) f32.
    Returns picked_row (TB, 1), fro (TB, 1), both float32.
    """
    # ---- NLL pick: dense one-hot select + lane reduce (no per-row scalar loops).
    col = lax.broadcasted_iota(jnp.int32, pred.shape, 1)                 # (TB, C)
    picked_row = jnp.sum(jnp.where(col == tgt, pred, 0.0),
                         axis=1, keepdims=True)                          # (TB, 1)

    # ---- Gram = T T^T without transposes ('bij,bkj->bik'), fed straight to MXU.
    gram = lax.dot_general(
        tr, tr,
        dimension_numbers=(((2,), (2,)), ((0,), (0,))),
        preferred_element_type=jnp.float32)                              # (TB, K, K)

    # Subtract identity, then square: single fused reduction tree and no
    # catastrophic cancellation for near-orthogonal T (unlike g2 - 2*t2 + K).
    ii = lax.broadcasted_iota(jnp.int32, gram.shape, 1)
    jj = lax.broadcasted_iota(jnp.int32, gram.shape, 2)
    diff = jnp.where(ii == jj, gram - 1.0, gram)                         # (TB, K, K)
    fro_sq = jnp.sum(jnp.sum(diff * diff, axis=2), axis=1, keepdims=True)  # (TB, 1)
    fro = jnp.sqrt(fro_sq)                                               # (TB, 1)
    return picked_row, fro


def _get_loss_single_kernel(B, mat_diff_loss_scale,
                            pred_ref, target_ref, trans_ref, out_ref):
    """Whole batch in one grid step: no scratch, no phases, no masking."""
    picked_row, fro = _tile_sums(pred_ref[...], target_ref[...], trans_ref[...])
    nll_sum = jnp.sum(picked_row, axis=0, keepdims=True)                 # (1, 1)
    fro_sum = jnp.sum(fro, axis=0, keepdims=True)                        # (1, 1)
    inv_b = jnp.float32(1.0 / B)
    out_ref[...] = (-nll_sum + fro_sum * jnp.float32(mat_diff_loss_scale)) * inv_b


def _get_loss_tiled_kernel(B, needs_mask,
                           pred_ref, target_ref, trans_ref, part_ref):
    """One independent batch tile per grid step; writes a (1, 8, 128) partial.

    Sublane 0 carries sum of picked log-probs, sublane 1 the sum of per-row
    Frobenius norms. No cross-step accumulation -> grid axis is 'parallel'
    (both TensorCores on v7x).
    """
    TB = pred_ref.shape[0]
    picked_row, fro = _tile_sums(pred_ref[...], target_ref[...], trans_ref[...])

    if needs_mask:  # statically skipped when B % TB == 0
        row = pl.program_id(0) * TB + lax.broadcasted_iota(jnp.int32, (TB, 1), 0)
        valid = row < B
        picked_row = jnp.where(valid, picked_row, 0.0)
        fro = jnp.where(valid, fro, 0.0)

    nll_sum = jnp.sum(picked_row, axis=0, keepdims=True)                 # (1, 1)
    fro_sum = jnp.sum(fro, axis=0, keepdims=True)                        # (1, 1)

    sub = lax.broadcasted_iota(jnp.int32, part_ref.shape, 1)             # (1, 8, 128)
    part_ref[...] = jnp.where(sub == 0, nll_sum,
                              jnp.where(sub == 1, fro_sum, 0.0))


def _choose_batch_tile(B, C, K):
    """Largest batch tile whose real VMEM footprint (lane-padded inputs,
    double-buffered, plus ~3x the trans tile for in-kernel temporaries:
    gram, diff, diff*diff) stays under v5e's 16 MiB default scoped VMEM."""
    lanes = 128
    k_pad = pl.cdiv(K, lanes) * lanes           # trans last dim padded to lane width
    c_pad = pl.cdiv(C, lanes) * lanes
    trans_bytes = 4 * K * k_pad                 # per sample, as resident in VMEM
    pred_bytes = 4 * c_pad
    tgt_bytes = 4 * lanes
    per_sample = 2 * (trans_bytes + pred_bytes + tgt_bytes) + 3 * trans_bytes
    budget = 12 * 1024 * 1024                   # headroom under 16 MiB default
    tb = max(8, budget // per_sample)
    if B <= tb:
        return B                                # whole batch in one grid step
    return int((tb // 8) * 8)                   # partial tiling: sublane-aligned TB


def get_loss(pred, target, trans_feat, mat_diff_loss_scale=0.001,
             batch_tile=None):
    """Pallas equivalent of pointnet_cls.get_loss.forward.

    pred:       (B, C) float32 log-probabilities (output of log_softmax)
    target:     (B,)   integer class ids
    trans_feat: (B, K, K) float32 feature-transform matrices
    batch_tile: optional override of the batch tile size (testing/tuning).
    """
    # TODO(synk): at realistic PointNet sizes this loss is launch-overhead
    # bound; the biggest end-to-end win is fusing the NLL pick into the
    # upstream log_softmax kernel (or letting XLA fuse the plain-JAX form)
    # rather than paying a standalone pallas_call.
    B, C = pred.shape
    Bt, K, K2 = trans_feat.shape
    assert Bt == B and K == K2

    pred = pred.astype(jnp.float32)
    trans_feat = trans_feat.astype(jnp.float32)
    target2d = target.astype(jnp.int32).reshape(B, 1)

    TB = batch_tile if batch_tile is not None else _choose_batch_tile(B, C, K)
    TB = min(TB, B)
    num_tiles = pl.cdiv(B, TB)

    in_specs = [
        pl.BlockSpec((TB, C), lambda t: (t, 0)),
        pl.BlockSpec((TB, 1), lambda t: (t, 0)),
        pl.BlockSpec((TB, K, K), lambda t: (t, 0, 0)),
    ]

    if num_tiles == 1:
        out = pl.pallas_call(
            functools.partial(_get_loss_single_kernel, B, mat_diff_loss_scale),
            grid_spec=pltpu.PrefetchScalarGridSpec(
                num_scalar_prefetch=0,
                grid=(1,),
                in_specs=in_specs,
                out_specs=pl.BlockSpec((1, 1), lambda t: (0, 0)),
            ),
            out_shape=jax.ShapeDtypeStruct((1, 1), jnp.float32),
            compiler_params=pltpu.CompilerParams(
                dimension_semantics=("arbitrary",)),
        )(pred, target2d, trans_feat)
        return out[0, 0]

    # Multi-tile: independent per-tile partials, combined in the wrapper.
    needs_mask = (B % TB) != 0
    parts = pl.pallas_call(
        functools.partial(_get_loss_tiled_kernel, B, needs_mask),
        grid_spec=pltpu.PrefetchScalarGridSpec(
            num_scalar_prefetch=0,
            grid=(num_tiles,),
            in_specs=in_specs,
            out_specs=pl.BlockSpec((1, 8, 128), lambda t: (t, 0, 0)),
        ),
        out_shape=jax.ShapeDtypeStruct((num_tiles, 8, 128), jnp.float32),
        compiler_params=pltpu.CompilerParams(
            # No cross-tile dependency -> fully parallel (2 TCs on v7x).
            dimension_semantics=("parallel",)),
    )(pred, target2d, trans_feat)

    nll_sum = jnp.sum(parts[:, 0, 0])
    fro_sum = jnp.sum(parts[:, 1, 0])
    return (-nll_sum + fro_sum * mat_diff_loss_scale) / B


def _reference_get_loss(pred, target, trans_feat, mat_diff_loss_scale=0.001):
    """Plain-JAX reference mirroring the PyTorch semantics."""
    nll = -jnp.mean(jnp.take_along_axis(pred, target[:, None], axis=1)[:, 0])
    K = trans_feat.shape[1]
    gram = jnp.einsum("bij,bkj->bik", trans_feat, trans_feat)
    diff = gram - jnp.eye(K, dtype=trans_feat.dtype)[None]
    mat_diff = jnp.mean(jnp.sqrt(jnp.sum(diff * diff, axis=(1, 2))))
    return nll + mat_diff * mat_diff_loss_scale


if __name__ == "__main__":
    key = jax.random.PRNGKey(0)

    # --- case 1: small batch -> single-tile specialized kernel ------------
    B, C, K = 4, 16, 32
    k_pred, k_tgt, k_trans, key = jax.random.split(key, 4)
    logits = jax.random.normal(k_pred, (B, C), dtype=jnp.float32)
    pred = jax.nn.log_softmax(logits, axis=-1)            # nll_loss expects log-probs
    target = jax.random.randint(k_tgt, (B,), 0, C, dtype=jnp.int32)
    trans_feat = jax.random.normal(k_trans, (B, K, K), dtype=jnp.float32) * 0.1

    loss = jax.block_until_ready(get_loss(pred, target, trans_feat))
    ref = _reference_get_loss(pred, target, trans_feat)
    assert jnp.abs(loss - ref) < 1e-4, (loss, ref)

    # --- case 2: forced multi-tile path (parallel grid + partial-tile mask) --
    B2 = 20
    k_pred, k_tgt, k_trans, key = jax.random.split(key, 4)
    logits2 = jax.random.normal(k_pred, (B2, C), dtype=jnp.float32)
    pred2 = jax.nn.log_softmax(logits2, axis=-1)
    target2 = jax.random.randint(k_tgt, (B2,), 0, C, dtype=jnp.int32)
    trans_feat2 = jax.random.normal(k_trans, (B2, K, K), dtype=jnp.float32) * 0.1

    loss2 = jax.block_until_ready(get_loss(pred2, target2, trans_feat2, batch_tile=8))
    ref2 = _reference_get_loss(pred2, target2, trans_feat2)
    assert jnp.abs(loss2 - ref2) < 1e-4, (loss2, ref2)

    print("KERNEL_OK")
</pallas_src>

<mosaic_0001>
module attributes {stable_mosaic.version = 11 : i64} {
  func.func @_get_loss_single_kernel(%arg0: i32, %arg1: memref<4x16xf32, #tpu.memory_space<vmem>>, %arg2: memref<4x1xi32, #tpu.memory_space<vmem>>, %arg3: memref<4x32x32xf32, #tpu.memory_space<vmem>>, %arg4: memref<1x1xf32, #tpu.memory_space<vmem>>) attributes {dimension_semantics = [#tpu.dimension_semantics<arbitrary>], iteration_bounds = array<i64: 1>, scalar_prefetch = 0 : i64, scratch_operands = 0 : i64, tpu.core_type = #tpu.core_type<tc>, window_params = [{transform_indices = @transform_0, window_bounds = array<i64: 4, 16>}, {transform_indices = @transform_1, window_bounds = array<i64: 4, 1>}, {transform_indices = @transform_2, window_bounds = array<i64: 4, 32, 32>}, {pipeline_mode = #tpu.pipeline_mode<synchronous>, transform_indices = @transform_3, window_bounds = array<i64: 1, 1>}]} {
    %c0 = arith.constant 0 : index
    %c0_0 = arith.constant 0 : index
    %0 = vector.load %arg1[%c0, %c0_0] : memref<4x16xf32, #tpu.memory_space<vmem>>, vector<4x16xf32>
    %c0_1 = arith.constant 0 : index
    %c0_2 = arith.constant 0 : index
    %1 = vector.load %arg2[%c0_1, %c0_2] : memref<4x1xi32, #tpu.memory_space<vmem>>, vector<4x1xi32>
    %c0_3 = arith.constant 0 : index
    %c0_4 = arith.constant 0 : index
    %c0_5 = arith.constant 0 : index
    %2 = vector.load %arg3[%c0_3, %c0_4, %c0_5] : memref<4x32x32xf32, #tpu.memory_space<vmem>>, vector<4x32x32xf32>
    %3 = tpu.iota {dimensions = array<i32: 1>} : vector<4x16xi32>
    %4 = vector.broadcast %1 : vector<4x1xi32> to vector<4x16xi32>
    %5 = arith.cmpi eq, %3, %4 : vector<4x16xi32>
    %cst = arith.constant 0.000000e+00 : f32
    %6 = vector.broadcast %cst : f32 to vector<4x16xf32>
    %7 = arith.select %5, %0, %6 : vector<4x16xi1>, vector<4x16xf32>
    %cst_6 = arith.constant dense<0.000000e+00> : vector<4xf32>
    %8 = vector.multi_reduction <add>, %7, %cst_6 [1] : vector<4x16xf32> to vector<4xf32>
    %9 = vector.shape_cast %8 : vector<4xf32> to vector<4x1xf32>
    %cst_7 = arith.constant dense<0.000000e+00> : vector<4x32x32xf32>
    %10 = tpu.matmul %2, %2, %cst_7 {dimension_numbers = #tpu.dot_dimension_numbers<[2], [2], [1], [1], [0, 0, 0, 1, 1, 1], [0], [0]>} : vector<4x32x32xf32>, vector<4x32x32xf32>, vector<4x32x32xf32> -> vector<4x32x32xf32>
    %11 = tpu.iota {dimensions = array<i32: 1>} : vector<4x32x32xi32>
    %12 = tpu.iota {dimensions = array<i32: 2>} : vector<4x32x32xi32>
    %13 = arith.cmpi eq, %11, %12 : vector<4x32x32xi32>
    %cst_8 = arith.constant 1.000000e+00 : f32
    %14 = vector.broadcast %cst_8 : f32 to vector<4x32x32xf32>
    %15 = arith.subf %10, %14 : vector<4x32x32xf32>
    %16 = arith.select %13, %15, %10 : vector<4x32x32xi1>, vector<4x32x32xf32>
    %17 = arith.mulf %16, %16 : vector<4x32x32xf32>
    %cst_9 = arith.constant dense<0.000000e+00> : vector<4x32xf32>
    %18 = vector.multi_reduction <add>, %17, %cst_9 [2] : vector<4x32x32xf32> to vector<4x32xf32>
    %cst_10 = arith.constant dense<0.000000e+00> : vector<4xf32>
    %19 = vector.multi_reduction <add>, %18, %cst_10 [1] : vector<4x32xf32> to vector<4xf32>
    %20 = vector.shape_cast %19 : vector<4xf32> to vector<4x1xf32>
    %21 = math.sqrt %20 : vector<4x1xf32>
    %cst_11 = arith.constant dense<0.000000e+00> : vector<1xf32>
    %22 = vector.multi_reduction <add>, %9, %cst_11 [0] : vector<4x1xf32> to vector<1xf32>
    %23 = vector.shape_cast %22 : vector<1xf32> to vector<1x1xf32>
    %cst_12 = arith.constant dense<0.000000e+00> : vector<1xf32>
    %24 = vector.multi_reduction <add>, %21, %cst_12 [0] : vector<4x1xf32> to vector<1xf32>
    %25 = vector.shape_cast %24 : vector<1xf32> to vector<1x1xf32>
    %cst_13 = arith.constant 0.000000e+00 : f32
    %26 = vector.broadcast %cst_13 : f32 to vector<1x1xf32>
    %27 = arith.subf %26, %23 : vector<1x1xf32>
    %cst_14 = arith.constant 1.000000e-03 : f32
    %28 = vector.broadcast %cst_14 : f32 to vector<1x1xf32>
    %29 = arith.mulf %25, %28 : vector<1x1xf32>
    %30 = arith.addf %27, %29 : vector<1x1xf32>
    %cst_15 = arith.constant 2.500000e-01 : f32
    %31 = vector.broadcast %cst_15 : f32 to vector<1x1xf32>
    %32 = arith.mulf %30, %31 : vector<1x1xf32>
    %c0_16 = arith.constant 0 : index
    %c0_17 = arith.constant 0 : index
    %33 = vector.load %arg4[%c0_16, %c0_17] : memref<1x1xf32, #tpu.memory_space<vmem>>, vector<1x1xf32>
    tpu.vector_store %arg4[%c0_16, %c0_17], %32 {strides = array<i32>} : memref<1x1xf32, #tpu.memory_space<vmem>>, vector<1x1xf32>,
    return
  }
  func.func @transform_0(%arg0: i32) -> (i32, i32) {
    %c0_i32 = arith.constant 0 : i32
    %c0_i32_0 = arith.constant 0 : i32
    return %arg0, %c0_i32 : i32, i32
  }
  func.func @transform_1(%arg0: i32) -> (i32, i32) {
    %c0_i32 = arith.constant 0 : i32
    %c0_i32_0 = arith.constant 0 : i32
    return %arg0, %c0_i32 : i32, i32
  }
  func.func @transform_2(%arg0: i32) -> (i32, i32, i32) {
    %c0_i32 = arith.constant 0 : i32
    %c0_i32_0 = arith.constant 0 : i32
    %c0_i32_1 = arith.constant 0 : i32
    return %arg0, %c0_i32, %c0_i32_0 : i32, i32, i32
  }
  func.func @transform_3(%arg0: i32) -> (i32, i32) {
    %c0_i32 = arith.constant 0 : i32
    %c0_i32_0 = arith.constant 0 : i32
    %c0_i32_1 = arith.constant 0 : i32
    return %c0_i32, %c0_i32_0 : i32, i32
  }
}

</mosaic_0001>

<bundles_post_ra>
// kernel: tpu_custom_call.1
= control target key start
LH: loop header
LB: loop body
LE: loop exit
PB: predicated region body
PF: predicated region fallthrough
CT: control target
= control target key end

     0   :  { %8 = vsyncpa [#allocation3], 0  ;;  %s1159_s0 = inlined_call_operand.vmem [shape: f32[4,16], index: 0, kind: input, shape index: {}]   ;;  %s1160_s1 = inlined_call_operand.vmem [shape: s32[4,1], index: 1, kind: input, shape index: {}]   ;;  %s1161_s2 = inlined_call_operand.hbm [shape: f32[4,32,32], index: 2, kind: input, shape index: {}]   ;;  %s1162_s3 = inlined_call_operand.hbm [shape: f32[1,1], index: 3, kind: output, shape index: {}]  }
   0x1   :  { %9 = vsyncpa [#allocation4], 0  ;;  %s944_s12 = smov [#allocation2]   ;;  %s896_s16 = scalar_lea.hbm %s1161_s2, 2048 }
   0x2   :  { %s19_s13 = sshll.u32 %s944_s12, 4  ;;  %p897_p0 = scmp.ne.s32.totalorder %s1161_s2, %s896_s16  ;;  %s20_s13 = int_to_ptr.vmem [resolvable:$true] %s19_s13 }
   0x3   :  { %p900_p1 = scmp.lt.u32.totalorder %s896_s16, %s1161_s2 }
   0x5   :  { %p902_p2 = pnand %p900_p1, %p897_p0 }
   0x7   :  { %905 = shalt.err (!%p902_p2)
}
   0x8   :  { %s906_s21 = scalar_lea.vmem %s20_s13, 2048  ;;  %p911_p4 = scmp.lt.s32.totalorder %s20_s13, %s20_s13 }
   0x9   :  { %p907_p3 = scmp.ne.s32.totalorder %s20_s13, %s906_s21  ;;  %p912_p5 = scmp.lt.s32.totalorder %s906_s21, %s906_s21 }
   0xb   :  { %p913_p6 = por %p912_p5, %p911_p4 }
   0xd   :  { %p914_p7 = pnand %p913_p6, %p907_p3 }
   0xf   :  { %917 = shalt.err (!%p914_p7)
}
  0x10   :  { %s945_s22 = smov 128   ;;  %s946_s23 = smov 8  }
  0x11   :  { %25 = dma.hbm_to_vmem [thread:$0]  %s1161_s2, 2048, %s20_s13, [#allocation3], %s945_s22, %s945_s22, %s946_s23  }
  0x12   :  { %940 = dma.done.wait [#allocation3], 2048  }
  0x13   :  { %941 = vsyncadd [#allocation3], 4294965248  ;;  %vm58_vm0 = vcmask 261120   ;;  %v31_v1 = vld [vmem:[#allocation2] sm:$0xff]  ;;  %v32_v2 = vld [vmem:[#allocation2 + $0x8] sm:$0xff]  ;;  %v947_v25 = vmov 0   ;;  %v47_v26 = vlaneseq }
  0x14   :  { %vm983_vm1 = vmpackc.low %vm58_vm0, %vm58_vm0  ;;  %v35_v3 = vld [vmem:[#allocation2 + $0x20] sm:$0xff]  ;;  %v840_v4 = vpack.c.bf16 %v32_v2, %v31_v1  ;;  %v36_v5 = vld [vmem:[#allocation2 + $0x28] sm:$0xff]  ;;  %792 = vmatprep.mubr.msk.f32.mxu0 %vm58_vm0, %v31_v1  ;;  %893 = vset.pattern.permute.xlu0 %v947_v25  ;;  %vm577_vm6 = vcmask 130112   ;;  %vm584_vm7 = vcmask 195712   ;;  %vm591_vm8 = vcmask 261312  }
  0x15   :  { %v33_v6 = vld [vmem:[#allocation2 + $0x10] sm:$0xff]  ;;  %v34_v7 = vld [vmem:[#allocation2 + $0x18] sm:$0xff]  ;;  %806 = vmatprep.mubr.msk.f32.mxu1 %vm58_vm0, %v35_v3  ;;  %v852_v8 = vpack.c.bf16 %v36_v5, %v35_v3  ;;  %v39_v13 = vld [vmem:[#allocation2 + $0x40] sm:$0xff]  ;;  %v1035_v27 = vshrl.u32 %v47_v26, 7  ;;  %v1037_v28 = vand.u32 127, %v47_v26  ;;  %vm650_vm9 = vcmask 1041409  }
  0x16   :  { %v846_v9 = vpack.c.bf16 %v34_v7, %v33_v6  ;;  %v37_v10 = vld [vmem:[#allocation2 + $0x30] sm:$0xff]  ;;  %v38_v11 = vld [vmem:[#allocation2 + $0x38] sm:$0xff]  ;;  %842 = vmatprep.subr.msk.bf16.mxu0 %vm983_vm1, %v840_v4  ;;  %v40_v14 = vld [vmem:[#allocation2 + $0x48] sm:$0xff]  ;;  %vm652_vm10 = vcmask 1042434   ;;  %vm654_vm11 = vcmask 1043459   ;;  %vm657_vm12 = vcmask 257024  }
  0x17   :  { %v858_v12 = vpack.c.bf16 %v38_v11, %v37_v10  ;;  %854 = vmatprep.subr.msk.bf16.mxu1 %vm983_vm1, %v852_v8  ;;  %845 = vmatpush3.bf16.xpose.msk.msra.mxu0 %vm983_vm1, %v840_v4  ;;  %v43_v15 = vld [vmem:[#allocation2 + $0x60] sm:$0xff]  ;;  %v44_v16 = vld [vmem:[#allocation2 + $0x68] sm:$0xff]  ;;  %v864_v17 = vpack.c.bf16 %v40_v14, %v39_v13  ;;  %v41_v19 = vld [vmem:[#allocation2 + $0x50] sm:$0xff]  ;;  %v1040_v29 = vadd.s32 8, %v1035_v27  ;;  %v1045_v31 = vadd.s32 24, %v1035_v27 }
  0x18   :  { %857 = vmatpush3.bf16.xpose.msk.msra.mxu1 %vm983_vm1, %v852_v8  ;;  %848 = vmatprep.subr.msk.bf16.mxu0 %vm983_vm1, %v846_v9  ;;  %v876_v18 = vpack.c.bf16 %v44_v16, %v43_v15  ;;  %v42_v20 = vld [vmem:[#allocation2 + $0x58] sm:$0xff]  ;;  %v45_v21 = vld [vmem:[#allocation2 + $0x70] sm:$0xff]  ;;  %vm452_vm3 = vcmp.eq.s32.totalorder %v1035_v27, %v1037_v28  ;;  %v1053_v40 = vadd.s32 16, %v1035_v27  ;;  %vm54_vm13 = vcmask 125952  }
  0x19   :  { %860 = vmatprep.subr.msk.bf16.mxu1 %vm983_vm1, %v858_v12  ;;  %v46_v22 = vld [vmem:[#allocation2 + $0x78] sm:$0xff]  ;;  %v870_v23 = vpack.c.bf16 %v42_v20, %v41_v19  ;;  %vm453_vm2 = vcmp.eq.s32.totalorder %v1040_v29, %v1037_v28  ;;  %vm455_vm4 = vcmp.eq.s32.totalorder %v1045_v31, %v1037_v28  ;;  %v30_v31 = vld [vmem:[%s1160_s1] sm:$0xf]  ;;  %vm668_vm15 = vcmask 1043456  }
  0x1a   :  { %v882_v24 = vpack.c.bf16 %v46_v22, %v45_v21  ;;  %vm454_vm5 = vcmp.eq.s32.totalorder %v1053_v40, %v1037_v28 }
  0x1f   :  { %851 = vmatpush3.bf16.xpose.msk.msra.mxu0 %vm983_vm1, %v846_v9 }
  0x20   :  { %863 = vmatpush3.bf16.xpose.msk.msra.mxu1 %vm983_vm1, %v858_v12  ;;  %866 = vmatprep.subr.msk.bf16.mxu0 %vm983_vm1, %v864_v17 }
  0x21   :  { %878 = vmatprep.subr.msk.bf16.mxu1 %vm983_vm1, %v876_v18 }
  0x26   :  { %793 = vmatmul.mubr.msk.f32.vlgmr.msra.gmra.mrb[0].mxu0 %vm58_vm0, %v32_v2 }
  0x27   :  { %807 = vmatmul.mubr.msk.f32.vlgmr.msra.gmra.mrb[0].mxu1 %vm58_vm0, %v36_v5  ;;  %869 = vmatpush3.bf16.xpose.msk.msra.mxu0 %vm983_vm1, %v864_v17 }
  0x28   :  { %881 = vmatpush3.bf16.xpose.msk.msra.mxu1 %vm983_vm1, %v876_v18  ;;  %795 = vmatprep.mubr.msk.f32.mxu0 %vm58_vm0, %v33_v6 }
  0x29   :  { %809 = vmatprep.mubr.msk.f32.mxu1 %vm58_vm0, %v37_v10  ;;  %872 = vmatprep.subr.msk.bf16.mxu0 %vm983_vm1, %v870_v23 }
  0x2a   :  { %796 = vmatmul.mubr.msk.f32.gmra.mrb[2].mxu0 %vm58_vm0, %v34_v7  ;;  %884 = vmatprep.subr.msk.bf16.mxu1 %vm983_vm1, %v882_v24 }
  0x2b   :  { %810 = vmatmul.mubr.msk.f32.gmra.mrb[2].mxu1 %vm58_vm0, %v38_v11  ;;  %820 = vmatprep.mubr.msk.f32.mxu0 %vm58_vm0, %v39_v13 }
  0x2c   :  { %834 = vmatprep.mubr.msk.f32.mxu1 %vm58_vm0, %v43_v15 }
  0x2f   :  { %875 = vmatpush3.bf16.xpose.msk.msra.mxu0 %vm983_vm1, %v870_v23 }
  0x30   :  { %887 = vmatpush3.bf16.xpose.msk.msra.mxu1 %vm983_vm1, %v882_v24 }
  0x36   :  { %821 = vmatmul.mubr.msk.f32.vlgmr.msra.gmra.mrb[4].mxu0 %vm58_vm0, %v40_v14 }
  0x37   :  { %835 = vmatmul.mubr.msk.f32.vlgmr.msra.gmra.mrb[4].mxu1 %vm58_vm0, %v44_v16  ;;  %823 = vmatprep.mubr.msk.f32.mxu0 %vm58_vm0, %v41_v19 }
  0x38   :  { %837 = vmatprep.mubr.msk.f32.mxu1 %vm58_vm0, %v45_v21 }
  0x3a   :  { %824 = vmatmul.mubr.msk.f32.gmra.mrb[6].mxu0 %vm58_vm0, %v42_v20 }
  0x3b   :  { %838 = vmatmul.mubr.msk.f32.gmra.mrb[6].mxu1 %vm58_vm0, %v46_v22 }
  0xf9   :  { %v794_v30 = vpop.f32.mrb[0].mxu0 }
  0xfa   :  { %v737_v32 = vadd.f32 -1.0, %v794_v30  ;;  %v808_v33 = vpop.f32.mrb[0].mxu1  ;;  %v137_v34 = vpop.f32.mrb[1].mxu0 }
  0xfb   :  { %v741_v35 = vadd.f32 -1.0, %v808_v33  ;;  %v736_v36 = vadd.f32 -1.0, %v137_v34  ;;  %v234_v37 = vpop.f32.mrb[1].mxu1 }
  0xfc   :  { %v473_v38 = vsel %vm453_vm2, %v737_v32, %v794_v30  ;;  %v740_v39 = vadd.f32 -1.0, %v234_v37 }
  0xfd   :  { %v477_v41 = vsel %vm453_vm2, %v741_v35, %v808_v33  ;;  %v472_v42 = vsel %vm452_vm3, %v736_v36, %v137_v34  ;;  %v797_v43 = vpop.f32.mrb[2].mxu0  ;;  %v489_v44 = vmul.f32 %v473_v38, %v473_v38 }
  0xfe   :  { %v476_v45 = vsel %vm452_vm3, %v740_v39, %v234_v37  ;;  %v739_v46 = vadd.f32 -1.0, %v797_v43  ;;  %v147_v47 = vpop.f32.mrb[3].mxu0  ;;  %v811_v48 = vpop.f32.mrb[2].mxu1  ;;  %v493_v49 = vmul.f32 %v477_v41, %v477_v41  ;;  %v488_v50 = vmul.f32 %v472_v42, %v472_v42 }
  0xff   :  { %v743_v51 = vadd.f32 -1.0, %v811_v48  ;;  %v244_v52 = vpop.f32.mrb[3].mxu1  ;;  %v507_v53 = vsel %vm58_vm0, %v489_v44, 0.0  ;;  %v492_v54 = vmul.f32 %v476_v45, %v476_v45  ;;  %v738_v56 = vadd.f32 -1.0, %v147_v47 }
 0x100   :  { %v475_v55 = vsel %vm455_vm4, %v739_v46, %v797_v43  ;;  %v519_v57 = vsel %vm58_vm0, %v493_v49, 0.0  ;;  %508 = vadd.xlane.f32.xlu0 %v507_v53  ;;  %v742_v59 = vadd.f32 -1.0, %v244_v52  ;;  %v504_v62 = vsel %vm58_vm0, %v488_v50, 0.0 }
 0x101   :  { %v479_v58 = vsel %vm455_vm4, %v743_v51, %v811_v48  ;;  %520 = vadd.xlane.f32.xlu1 %v519_v57  ;;  %v491_v61 = vmul.f32 %v475_v55, %v475_v55  ;;  %v474_v63 = vsel %vm454_vm5, %v738_v56, %v147_v47  ;;  %v516_v0 = vsel %vm58_vm0, %v492_v54, 0.0 }
 0x102   :  { %v495_v60 = vmul.f32 %v479_v58, %v479_v58  ;;  %v478_v1 = vsel %vm454_vm5, %v742_v59, %v244_v52  ;;  %v490_v3 = vmul.f32 %v474_v63, %v474_v63  ;;  %v579_v59 = vadd.s32 4294967280, %v1037_v28 }
 0x103   :  { %v513_v4 = vsel %vm58_vm0, %v491_v61, 0.0  ;;  %v494_v5 = vmul.f32 %v478_v1, %v478_v1  ;;  %v570_v61 = vsub.s32 %v1037_v28, %v1035_v27 }
 0x104   :  { %505 = vadd.xlane.f32.xlu0 %v504_v62  ;;  %v525_v2 = vsel %vm58_vm0, %v495_v60, 0.0  ;;  %v510_v13 = vsel %vm58_vm0, %v490_v3, 0.0  ;;  %v572_v60 = vadd.s32 4294967288, %v1037_v28  ;;  %v582_v1 = vsub.s32 %v579_v59, %v1035_v27 }
 0x105   :  { %517 = vadd.xlane.f32.xlu1 %v516_v0  ;;  %v522_v16 = vsel %vm58_vm0, %v494_v5, 0.0  ;;  %v586_v0 = vadd.s32 4294967272, %v1037_v28 }
 0x108   :  { %514 = vadd.xlane.f32.xlu0 %v513_v4 }
 0x109   :  { %526 = vadd.xlane.f32.xlu1 %v525_v2  ;;  %v822_v6 = vpop.f32.mrb[4].mxu0  ;;  %v575_v2 = vsub.s32 %v572_v60, %v1035_v27 }
 0x10a   :  { %v745_v7 = vadd.f32 -1.0, %v822_v6  ;;  %v836_v8 = vpop.f32.mrb[4].mxu1  ;;  %v331_v9 = vpop.f32.mrb[5].mxu0 }
 0x10b   :  { %v749_v10 = vadd.f32 -1.0, %v836_v8  ;;  %v744_v11 = vadd.f32 -1.0, %v331_v9  ;;  %v428_v12 = vpop.f32.mrb[5].mxu1 }
 0x10c   :  { %v481_v14 = vsel %vm453_vm2, %v745_v7, %v822_v6  ;;  %v748_v15 = vadd.f32 -1.0, %v428_v12  ;;  %511 = vadd.xlane.f32.xlu0 %v510_v13  ;;  %v589_v7 = vsub.s32 %v586_v0, %v1035_v27 }
 0x10d   :  { %v497_v17 = vmul.f32 %v481_v14, %v481_v14  ;;  %v485_v18 = vsel %vm453_vm2, %v749_v10, %v836_v8  ;;  %v480_v19 = vsel %vm452_vm3, %v744_v11, %v331_v9  ;;  %523 = vadd.xlane.f32.xlu1 %v522_v16  ;;  %v825_v20 = vpop.f32.mrb[6].mxu0  ;;  %vm687_vm2 = vcmask 0  }
 0x10e   :  { %v501_v21 = vmul.f32 %v485_v18, %v485_v18  ;;  %v484_v22 = vsel %vm452_vm3, %v748_v15, %v428_v12  ;;  %v747_v23 = vadd.f32 -1.0, %v825_v20  ;;  %v341_v24 = vpop.f32.mrb[7].mxu0  ;;  %v839_v25 = vpop.f32.mrb[6].mxu1  ;;  %v496_v29 = vmul.f32 %v480_v19, %v480_v19 }
 0x10f   :  { %v746_v26 = vadd.f32 -1.0, %v341_v24  ;;  %v531_v30 = vsel %vm58_vm0, %v497_v17, 0.0  ;;  %v438_v32 = vpop.f32.mrb[7].mxu1  ;;  %v500_v33 = vmul.f32 %v484_v22, %v484_v22  ;;  %v751_v37 = vadd.f32 -1.0, %v839_v25 }
 0x110   :  { %v543_v34 = vsel %vm58_vm0, %v501_v21, 0.0  ;;  %v483_v35 = vsel %vm455_vm4, %v747_v23, %v825_v20  ;;  %v750_v38 = vadd.f32 -1.0, %v438_v32  ;;  %v528_v43 = vsel %vm58_vm0, %v496_v29, 0.0 }
 0x111   :  { %v482_v36 = vsel %vm454_vm5, %v746_v26, %v341_v24  ;;  %544 = vadd.xlane.f32.xlu0 %v543_v34  ;;  %532 = vadd.xlane.f32.xlu1 %v531_v30  ;;  %v499_v39 = vmul.f32 %v483_v35, %v483_v35  ;;  %v540_v42 = vsel %vm58_vm0, %v500_v33, 0.0  ;;  %v487_v44 = vsel %vm455_vm4, %v751_v37, %v839_v25 }
 0x112   :  { %v498_v41 = vmul.f32 %v482_v36, %v482_v36  ;;  %v486_v45 = vsel %vm454_vm5, %v750_v38, %v438_v32  ;;  %v503_v46 = vmul.f32 %v487_v44, %v487_v44 }
 0x113   :  { %v502_v47 = vmul.f32 %v486_v45, %v486_v45  ;;  %v537_v48 = vsel %vm58_vm0, %v499_v39, 0.0  ;;  %v29_v45 = vld [vmem:[%s1159_s0] sm:$0xf]  ;;  %s948_s0 = smov [#allocation5]  }
 0x114   :  { %v534_v49 = vsel %vm58_vm0, %v498_v41, 0.0  ;;  %v549_v50 = vsel %vm58_vm0, %v503_v46, 0.0  ;;  %s695_s28 = sshll.u32 %s948_s0, 4  ;;  %s696_s28 = int_to_ptr.vmem [resolvable:$true] %s695_s28 }
 0x115   :  { %541 = vadd.xlane.f32.xlu1 %v540_v42  ;;  %529 = vadd.xlane.f32.xlu0 %v528_v43  ;;  %v546_v51 = vsel %vm58_vm0, %v502_v47, 0.0  ;;  %s918_s29 = scalar_lea.vmem %s696_s28, 16  ;;  %s922_s30 = scalar_lea.vmem %s696_s28, 32 }
 0x116   :  { %p919_p8 = scmp.ne.s32.totalorder %s696_s28, %s918_s29  ;;  %p923_p9 = scmp.lt.s32.totalorder %s696_s28, %s696_s28 }
 0x117   :  { %p924_p10 = scmp.lt.s32.totalorder %s922_s30, %s918_s29 }
 0x119   :  { %538 = vadd.xlane.f32.xlu1 %v537_v48  ;;  %535 = vadd.xlane.f32.xlu0 %v534_v49  ;;  %p925_p11 = por %p924_p10, %p923_p9 }
 0x11b   :  { %p926_p12 = pnand %p925_p11, %p919_p8 }
 0x11d   :  { %550 = vadd.xlane.f32.xlu1 %v549_v50  ;;  %547 = vadd.xlane.f32.xlu0 %v546_v51 }
 0x133   :  { %50 = vperm.xlu0 %893, %v30_v31  }
 0x18d   :  { %v509_v40 = vpop.xlane.xlu0 %508 }
 0x18e   :  { %v521_v52 = vpop.xlane.xlu1 %520  ;;  %v576_v11 = vrot.slane %v509_v40, %v575_v2 }
 0x18f   :  { %v600_v10 = vrot.slane %v521_v52, %v575_v2 }
 0x191   :  { %v506_v53 = vpop.xlane.xlu0 %505 }
 0x192   :  { %v518_v54 = vpop.xlane.xlu1 %517  ;;  %v571_v4 = vrot.slane %v506_v53, %v570_v61 }
 0x193   :  { %v596_v3 = vrot.slane %v518_v54, %v570_v61 }
 0x194   :  { %v578_v14 = vsel %vm577_vm6, %v576_v11, %v571_v4 }
 0x195   :  { %v515_v55 = vpop.xlane.xlu0 %514  ;;  %v601_v13 = vsel %vm577_vm6, %v600_v10, %v596_v3 }
 0x196   :  { %v527_v56 = vpop.xlane.xlu1 %526  ;;  %v590_v22 = vrot.slane %v515_v55, %v589_v7 }
 0x197   :  { %v610_v21 = vrot.slane %v527_v56, %v589_v7 }
 0x199   :  { %v512_v57 = vpop.xlane.xlu0 %511 }
 0x19a   :  { %v524_v58 = vpop.xlane.xlu1 %523  ;;  %v583_v9 = vrot.slane %v512_v57, %v582_v1 }
 0x19b   :  { %v605_v8 = vrot.slane %v524_v58, %v582_v1 }
 0x19c   :  { %v585_v19 = vsel %vm584_vm7, %v583_v9, %v578_v14 }
 0x19d   :  { %v606_v18 = vsel %vm584_vm7, %v605_v8, %v601_v13  ;;  %v592_v30 = vsel %vm591_vm8, %v590_v22, %v585_v19 }
 0x19e   :  { %v545_v62 = vpop.xlane.xlu0 %544  ;;  %v533_v63 = vpop.xlane.xlu1 %532  ;;  %v611_v26 = vsel %vm591_vm8, %v610_v21, %v606_v18 }
 0x19f   :  { %v619_v15 = vrot.slane %v533_v63, %v575_v2  ;;  %v638_v32 = vrot.slane %v545_v62, %v575_v2  ;;  %v651_v39 = vsel %vm650_vm9, %v611_v26, %v592_v30 }
 0x1a2   :  { %v542_v5 = vpop.xlane.xlu1 %541  ;;  %v530_v6 = vpop.xlane.xlu0 %529 }
 0x1a3   :  { %v615_v12 = vrot.slane %v530_v6, %v570_v61  ;;  %v634_v23 = vrot.slane %v542_v5, %v570_v61 }
 0x1a5   :  { %v620_v24 = vsel %vm577_vm6, %v619_v15, %v615_v12  ;;  %v639_v37 = vsel %vm577_vm6, %v638_v32, %v634_v23 }
 0x1a6   :  { %v539_v16 = vpop.xlane.xlu1 %538  ;;  %v536_v17 = vpop.xlane.xlu0 %535 }
 0x1a7   :  { %v629_v20 = vrot.slane %v539_v16, %v589_v7  ;;  %v624_v27 = vrot.slane %v536_v17, %v582_v1 }
 0x1a9   :  { %v625_v25 = vsel %vm584_vm7, %v624_v27, %v620_v24 }
 0x1aa   :  { %v551_v29 = vpop.xlane.xlu1 %550  ;;  %v548_v33 = vpop.xlane.xlu0 %547  ;;  %v630_v36 = vsel %vm591_vm8, %v629_v20, %v625_v25 }
 0x1ab   :  { %v648_v34 = vrot.slane %v551_v29, %v589_v7  ;;  %v643_v35 = vrot.slane %v548_v33, %v582_v1  ;;  %v653_v42 = vsel %vm652_vm10, %v630_v36, %v651_v39 }
 0x1ad   :  { %v644_v38 = vsel %vm584_vm7, %v643_v35, %v639_v37 }
 0x1ae   :  { %v649_v41 = vsel %vm591_vm8, %v648_v34, %v644_v38 }
 0x1af   :  { %v655_v43 = vsel %vm654_vm11, %v649_v41, %v653_v42 }
 0x1b0   :  { %v658_v44 = vsel %vm657_vm12, %v655_v43, 0.0 }
 0x1b1   :  { %659 = vadd.xlane.f32.xlu1 %v658_v44 }
 0x1b2   :  { %v51_v46 = vpop.permute.xlu0 %50 }
 0x1b3   :  { %vm52_vm14 = vcmp.eq.s32.totalorder %v1037_v28, %v51_v46 }
 0x1b4   :  { %v53_v47 = vsel %vm52_vm14, %v29_v45, 0.0 }
 0x1b5   :  { %v55_v48 = vsel %vm54_vm13, %v53_v47, 0.0 }
 0x1b6   :  { %56 = vadd.xlane.f32.xlu1 %v55_v48 }
 0x23e   :  { %v660_v49 = vpop.xlane.xlu1 %659 }
 0x23f   :  { %894 = vrsqrt.f32 %v660_v49  ;;  %vm663_vm0 = vcmp.eq.f32.partialorder %v660_v49, inf  ;;  %v666_v54 = vand.u32 2147483648, %v660_v49  ;;  %vm665_vm1 = vcmp.eq.f32.partialorder %v660_v49, 0.0 }
 0x243   :  { %v57_v50 = vpop.xlane.xlu1 %56 }
 0x244   :  { %v669_v51 = vsel %vm668_vm15, %v57_v50, 0.0 }
 0x245   :  { %v670_v31 = vrot.slane %v669_v51, 4 }
 0x247   :  { %v671_v40 = vadd.f32 %v670_v31, %v669_v51 }
 0x249   :  { %v895_v52 = vpop.eup %894  ;;  %v672_v55 = vrot.slane %v671_v40, 2 }
 0x24a   :  { %v662_v53 = vmul.f32 %v895_v52, %v660_v49 }
 0x24b   :  { %v673_v59 = vadd.f32 %v672_v55, %v671_v40 }
 0x24c   :  { %v664_v56 = vsel %vm663_vm0, %v660_v49, %v662_v53 }
 0x24d   :  { %v667_v57 = vsel %vm665_vm1, %v666_v54, %v664_v56  ;;  %v674_v62 = vrot.slane %v673_v59, 1 }
 0x24e   :  { %v676_v58 = vsel %vm668_vm15, %v667_v57, 0.0 }
 0x24f   :  { %v677_v28 = vrot.slane %v676_v58, 4  ;;  %v675_v1 = vadd.f32 %v674_v62, %v673_v59 }
 0x251   :  { %v678_v60 = vadd.f32 %v677_v28, %v676_v58  ;;  %v683_v4 = vsub.f32 0.0, %v675_v1 }
 0x253   :  { %v679_v61 = vrot.slane %v678_v60, 2 }
 0x255   :  { %v680_v63 = vadd.f32 %v679_v61, %v678_v60 }
 0x257   :  { %v681_v0 = vrot.slane %v680_v63, 1 }
 0x259   :  { %v682_v2 = vadd.f32 %v681_v0, %v680_v63 }
 0x25b   :  { %v684_v3 = vmul.f32 0.001, %v682_v2 }
 0x25d   :  { %v685_v5 = vadd.f32 %v684_v3, %v683_v4 }
 0x25f   :  { %v686_v6 = vmul.f32 0.25, %v685_v5 }
 0x261   :  { %688 = vst.msk [vmem:[#allocation5] sm:$0x1] %vm687_vm2, %v686_v6 }
 0x262   :  { %929 = shalt.err (!%p926_p12)
}
 0x263   :  { %s930_s6 = scalar_lea.hbm %s1162_s3, 16 }
 0x264   :  { %p931_p13 = scmp.ne.s32.totalorder %s1162_s3, %s930_s6  ;;  %p934_p0 = scmp.lt.u32.totalorder %s930_s6, %s1162_s3 }
 0x266   :  { %p936_p1 = pnand %p934_p0, %p931_p13 }
 0x268   :  { %939 = shalt.err (!%p936_p1)
}
 0x269   :  { %698 = dma.vmem_to_hbm [thread:$0]  %s696_s28, 16, %s1162_s3, [#allocation4]  }
 0x26a   :  { %942 = dma.done.wait [#allocation4], 16  }
 0x26b   :  { %943 = vsyncadd [#allocation4], 4294967280 }
 0x26c   :  { %702 = vsyncpa [#allocation3], 1 }
 0x26d   :  { %703 = vsyncpa [#allocation4], 1 }

</bundles_post_ra>
